<compile_context>
chip_gen: v5e
topology: v5e:2x2
jax: 0.10.0
libtpu: 0.0.40
codegen_flags: <defaults>
</compile_context>

<pallas_src>
import functools

import jax
import jax.numpy as jnp
from jax import lax
from jax.experimental import pallas as pl
from jax.experimental.pallas import tpu as pltpu


def _user_encoder_kernel(logv_ref, bias_ref, news_ref, w1n_ref, w1l_ref, b1_ref,
                         w2_ref, out_ref, logits_ref, *, h_chunk):
    f32 = jnp.float32
    Bt, H, D = logv_ref.shape
    N = news_ref.shape[1]
    A = w1n_ref.shape[1]

    Ht = h_chunk
    n_chunks = H // Ht                       # wrapper guarantees divisibility

    news = news_ref[...]                     # (Bt, N, D)
    w1l = w1l_ref[...]                       # (D, A)
    b1 = b1_ref[...]                         # (1, A)
    w2 = w2_ref[...]                         # (1, A)

    # Candidate projection: one fused MXU call across the whole batch block.
    proj_news = jnp.dot(news.reshape(Bt * N, D), w1n_ref[...],
                        preferred_element_type=f32).reshape(Bt, 1, N, A)

    # History axis tiled so the tanh'd hidden tensor is bounded to (Bt, Ht, N, A).
    def chunk_body(hc, carry):
        start = pl.multiple_of(hc * Ht, Ht)
        logv_c = logv_ref[:, pl.ds(start, Ht), :]                        # (Bt, Ht, D)
        proj_log = jnp.dot(logv_c.reshape(Bt * Ht, D), w1l,
                           preferred_element_type=f32) + b1              # (Bt*Ht, A)
        hidden = jnp.tanh(proj_log.reshape(Bt, Ht, 1, A) + proj_news)    # (Bt,Ht,N,A)
        # affine2 weight reduce over A -> per-chunk logits, stored at sublane offset.
        logits_ref[:, pl.ds(start, Ht), :] = jnp.sum(hidden * w2, axis=-1)
        return carry

    lax.fori_loop(0, n_chunks, chunk_body, 0)

    # (Bt, H, N) -> (Bt, N, H); add additive mask bias (mask==0 -> -1e9, b2 folded).
    logits = jnp.swapaxes(logits_ref[...], 1, 2) + bias_ref[...]         # (Bt, N, H)

    # Masked softmax over the history axis (exact normalization).
    m = jnp.max(logits, axis=-1, keepdims=True)
    e = jnp.exp(logits - m)
    attn = e / jnp.sum(e, axis=-1, keepdims=True)                        # (Bt, N, H)

    # Weighted sum of history vectors (batched MXU contraction over H).
    out_ref[...] = jnp.einsum("bnh,bhd->bnd", attn, logv_ref[...],
                              preferred_element_type=f32).astype(out_ref.dtype)


def _pick_block_b(B, H, N, D, A, h_chunk, budget_bytes=24 * 1024 * 1024):
    """Largest divisor of B whose per-step VMEM footprint fits the budget."""
    best = 1
    for bb in range(1, B + 1):
        if B % bb:
            continue
        stream = 2 * (bb * H * D + bb * H + 2 * bb * N * D)          # double-buffered blocks
        weights = 2 * (2 * D * A + 2 * A)                            # double-buffered weights
        live = (bb * N * h_chunk * A + bb * h_chunk * A + bb * N * A
                + 3 * bb * H * N + bb * N * D)                       # hidden chunk + logits/attn + out
        if 4 * (stream + weights + live) <= budget_bytes:
            best = bb
    # Keep >= 2 grid steps so both v7x TensorCores get work and the pipeline overlaps.
    if best == B and B > 1:
        smaller = [d for d in range(1, B) if B % d == 0]
        if smaller:
            best = smaller[-1]
    return best


def user_encoder(log_vec, log_mask, news_vec, w1, b1, w2, b2, *,
                 block_b=None, h_chunk=64):
    """Forward pass of UserEncoder.

    log_vec : (B, H, D)  history news vectors
    log_mask: (B, H)     0/1 history mask
    news_vec: (B, N, D)  candidate news vectors
    w1      : (A, 2D)    affine1 = nn.Linear(2D, A) weight (torch layout)
    b1      : (A,)       affine1 bias
    w2      : (1, A)     affine2 = nn.Linear(A, 1) weight
    b2      : (1,)       affine2 bias
    returns : (B, N, D)
    """
    B, H, D = log_vec.shape
    N = news_vec.shape[1]
    A = w1.shape[0]
    assert w1.shape == (A, 2 * D), "affine1 weight must be (attention_dim, 2*news_dim)"
    f32 = jnp.float32

    # TODO(synk): for production, store log_vec/news_vec/out as bf16 in HBM (keep f32
    # MXU accumulation) to halve DMA bytes; kept f32 here for exact module numerics.

    # Split the concat Linear into its news / log halves, pre-transposed to (D, A).
    w1f = jnp.asarray(w1, f32)
    w1n = w1f[:, :D].T
    w1l = w1f[:, D:].T
    b1v = jnp.asarray(b1, f32).reshape(1, A)
    w2v = jnp.asarray(w2, f32).reshape(1, A)
    b2s = jnp.asarray(b2, f32).reshape(())

    # Additive mask bias with b2 folded in (softmax is shift-invariant, so this is
    # exactly the PyTorch masked_fill(-1e9) + b2 path); broadcasts over candidates.
    bias = jnp.where(jnp.asarray(log_mask, f32) == 0.0,
                     jnp.float32(-1e9), jnp.float32(0.0)) + b2s
    bias = bias.reshape(B, 1, H)

    h_chunk = max(1, min(h_chunk, H))
    if H % h_chunk != 0:
        h_chunk = H                      # fall back to a single chunk for awkward H

    if block_b is None:
        block_b = _pick_block_b(B, H, N, D, A, h_chunk)
    assert B % block_b == 0, "block_b must divide the batch size"
    grid = (B // block_b,)

    flops = int(2 * B * D * A * (N + H) + 3 * B * N * H * A + 2 * B * N * H * D)
    transcendentals = int(B * N * H * (A + 1))
    bytes_accessed = int(4 * (B * H * D + 2 * B * N * D + B * H + 2 * D * A + 2 * A))

    grid_spec = pltpu.PrefetchScalarGridSpec(
        num_scalar_prefetch=0,
        grid=grid,
        in_specs=[
            pl.BlockSpec((block_b, H, D), lambda b: (b, 0, 0)),   # log_vec
            pl.BlockSpec((block_b, 1, H), lambda b: (b, 0, 0)),   # mask bias (+ b2)
            pl.BlockSpec((block_b, N, D), lambda b: (b, 0, 0)),   # news_vec
            # Grid-invariant weights: constant block index, so the pipeline never
            # re-copies them.  TODO(synk): on v7x, pipeline_mode=pl.Buffered(1) here
            # reclaims the second weight buffer for a larger block_b.
            pl.BlockSpec((D, A), lambda b: (0, 0)),               # W1 news half
            pl.BlockSpec((D, A), lambda b: (0, 0)),               # W1 log half
            pl.BlockSpec((1, A), lambda b: (0, 0)),               # b1
            pl.BlockSpec((1, A), lambda b: (0, 0)),               # w2
        ],
        out_specs=pl.BlockSpec((block_b, N, D), lambda b: (b, 0, 0)),
        scratch_shapes=[pltpu.VMEM((block_b, H, N), jnp.float32)],   # per-block logits
    )

    return pl.pallas_call(
        functools.partial(_user_encoder_kernel, h_chunk=h_chunk),
        out_shape=jax.ShapeDtypeStruct((B, N, D), f32),
        grid_spec=grid_spec,
        compiler_params=pltpu.CompilerParams(
            dimension_semantics=("parallel",),
            vmem_limit_bytes=48 * 1024 * 1024),
        cost_estimate=pl.CostEstimate(flops=flops,
                                      transcendentals=transcendentals,
                                      bytes_accessed=bytes_accessed),
    )(jnp.asarray(log_vec, f32), bias, jnp.asarray(news_vec, f32),
      w1n, w1l, b1v, w2v)


def user_encoder_ref(log_vec, log_mask, news_vec, w1, b1, w2, b2):
    """Pure-JAX mirror of the PyTorch forward."""
    B, H, D = log_vec.shape
    N = news_vec.shape[1]
    A = w1.shape[0]
    news_e = jnp.broadcast_to(news_vec[:, :, None, :], (B, N, H, D))
    log_e = jnp.broadcast_to(log_vec[:, None, :, :], (B, N, H, D))
    con = jnp.concatenate([news_e, log_e], axis=3)                       # (B, N, H, 2D)
    hidden = jnp.tanh(con @ w1.T + b1)                                   # (B, N, H, A)
    logits = (hidden @ w2.reshape(A, 1)).squeeze(-1) + b2.reshape(())    # (B, N, H)
    logits = jnp.where(log_mask[:, None, :] == 0, -1e9, logits)
    attn = jax.nn.softmax(logits, axis=2)
    return jnp.sum(attn[..., None] * log_e, axis=2)                      # (B, N, D)


if __name__ == "__main__":
    # args: n_heads=2 -> news_dim = 40 ; attention_dim = 32
    B, N, H = 4, 4, 16
    n_heads, attention_dim = 2, 32
    D = n_heads * 20
    A = attention_dim

    key = jax.random.PRNGKey(0)
    k1, k2, k3, k4, k5, k6, k7 = jax.random.split(key, 7)

    log_vec = jax.random.normal(k1, (B, H, D), dtype=jnp.float32)
    news_vec = jax.random.normal(k2, (B, N, D), dtype=jnp.float32)
    log_mask = (jax.random.uniform(k3, (B, H)) > 0.3).astype(jnp.float32)
    log_mask = log_mask.at[:, 0].set(1.0)       # at least one valid history slot

    w1 = jax.random.normal(k4, (A, 2 * D), dtype=jnp.float32) * 0.05    # affine1 weight
    b1 = jax.random.normal(k5, (A,), dtype=jnp.float32) * 0.05          # affine1 bias
    w2 = jax.random.normal(k6, (1, A), dtype=jnp.float32) * 0.05        # affine2 weight
    b2 = jax.random.normal(k7, (1,), dtype=jnp.float32) * 0.05          # affine2 bias

    # h_chunk=8 with H=16 exercises the in-kernel history-tiling loop (2 chunks);
    # block_b is auto-picked (-> 2, grid=(2,)) so both v7x TensorCores get work.
    out = user_encoder(log_vec, log_mask, news_vec, w1, b1, w2, b2, h_chunk=8)
    out = jax.block_until_ready(out)

    ref = user_encoder_ref(log_vec, log_mask, news_vec, w1, b1, w2, b2)
    assert out.shape == (B, N, D)
    assert jnp.allclose(out, ref, atol=1e-4, rtol=1e-4), "mismatch vs reference"
    print("KERNEL_OK")
</pallas_src>

<mosaic_0001>
module attributes {stable_mosaic.version = 11 : i64} {
  func.func @_user_encoder_kernel(%arg0: i32, %arg1: memref<2x16x40xf32, #tpu.memory_space<vmem>>, %arg2: memref<2x1x16xf32, #tpu.memory_space<vmem>>, %arg3: memref<2x4x40xf32, #tpu.memory_space<vmem>>, %arg4: memref<40x32xf32, #tpu.memory_space<vmem>>, %arg5: memref<40x32xf32, #tpu.memory_space<vmem>>, %arg6: memref<1x32xf32, #tpu.memory_space<vmem>>, %arg7: memref<1x32xf32, #tpu.memory_space<vmem>>, %arg8: memref<2x4x40xf32, #tpu.memory_space<vmem>>, %arg9: memref<2x16x4xf32, #tpu.memory_space<vmem>>) attributes {dimension_semantics = [#tpu.dimension_semantics<parallel>], iteration_bounds = array<i64: 2>, scalar_prefetch = 0 : i64, scratch_operands = 1 : i64, tpu.core_type = #tpu.core_type<tc>, window_params = [{transform_indices = @transform_0, window_bounds = array<i64: 2, 16, 40>}, {transform_indices = @transform_1, window_bounds = array<i64: 2, 1, 16>}, {transform_indices = @transform_2, window_bounds = array<i64: 2, 4, 40>}, {pipeline_mode = #tpu.pipeline_mode<synchronous>, transform_indices = @transform_3, window_bounds = array<i64: 40, 32>}, {pipeline_mode = #tpu.pipeline_mode<synchronous>, transform_indices = @transform_4, window_bounds = array<i64: 40, 32>}, {pipeline_mode = #tpu.pipeline_mode<synchronous>, transform_indices = @transform_5, window_bounds = array<i64: 1, 32>}, {pipeline_mode = #tpu.pipeline_mode<synchronous>, transform_indices = @transform_6, window_bounds = array<i64: 1, 32>}, {transform_indices = @transform_7, window_bounds = array<i64: 2, 4, 40>}]} {
    %c0 = arith.constant 0 : index
    %c0_0 = arith.constant 0 : index
    %c0_1 = arith.constant 0 : index
    %0 = vector.load %arg3[%c0, %c0_0, %c0_1] : memref<2x4x40xf32, #tpu.memory_space<vmem>>, vector<2x4x40xf32>
    %c0_2 = arith.constant 0 : index
    %c0_3 = arith.constant 0 : index
    %1 = vector.load %arg5[%c0_2, %c0_3] : memref<40x32xf32, #tpu.memory_space<vmem>>, vector<40x32xf32>
    %c0_4 = arith.constant 0 : index
    %c0_5 = arith.constant 0 : index
    %2 = vector.load %arg6[%c0_4, %c0_5] : memref<1x32xf32, #tpu.memory_space<vmem>>, vector<1x32xf32>
    %c0_6 = arith.constant 0 : index
    %c0_7 = arith.constant 0 : index
    %3 = vector.load %arg7[%c0_6, %c0_7] : memref<1x32xf32, #tpu.memory_space<vmem>>, vector<1x32xf32>
    %4 = vector.shape_cast %0 : vector<2x4x40xf32> to vector<8x40xf32>
    %c0_8 = arith.constant 0 : index
    %c0_9 = arith.constant 0 : index
    %5 = vector.load %arg4[%c0_8, %c0_9] : memref<40x32xf32, #tpu.memory_space<vmem>>, vector<40x32xf32>
    %cst = arith.constant dense<0.000000e+00> : vector<8x32xf32>
    %6 = tpu.matmul %4, %5, %cst {dimension_numbers = #tpu.dot_dimension_numbers<[1], [0], [0], [1], [0, 0, 1, 1], [], []>} : vector<8x40xf32>, vector<40x32xf32>, vector<8x32xf32> -> vector<8x32xf32>
    %7 = vector.shape_cast %6 : vector<8x32xf32> to vector<2x1x4x32xf32>
    %c0_i32 = arith.constant 0 : i32
    %c2_i32 = arith.constant 2 : i32
    %8 = arith.addi %c0_i32, %c2_i32 : i32
    %c1_i32 = arith.constant 1 : i32
    scf.for %arg10 = %c0_i32 to %8 step %c1_i32  : i32 {
      %c8_i32 = arith.constant 8 : i32
      %26 = arith.muli %arg10, %c8_i32 : i32
      %27 = tpu.assume_multiple %26, 8 : i32
      %c0_26 = arith.constant 0 : index
      %28 = arith.index_cast %27 : i32 to index
      %c0_27 = arith.constant 0 : index
      %29 = vector.load %arg1[%c0_26, %28, %c0_27] : memref<2x16x40xf32, #tpu.memory_space<vmem>>, vector<2x8x40xf32>
      %30 = vector.shape_cast %29 : vector<2x8x40xf32> to vector<16x40xf32>
      %cst_28 = arith.constant dense<0.000000e+00> : vector<16x32xf32>
      %31 = tpu.matmul %30, %1, %cst_28 {dimension_numbers = #tpu.dot_dimension_numbers<[1], [0], [0], [1], [0, 0, 1, 1], [], []>} : vector<16x40xf32>, vector<40x32xf32>, vector<16x32xf32> -> vector<16x32xf32>
      %32 = vector.broadcast %2 : vector<1x32xf32> to vector<16x32xf32>
      %33 = arith.addf %31, %32 : vector<16x32xf32>
      %34 = vector.shape_cast %33 : vector<16x32xf32> to vector<2x8x1x32xf32>
      %35 = vector.broadcast %34 : vector<2x8x1x32xf32> to vector<2x8x4x32xf32>
      %36 = vector.broadcast %7 : vector<2x1x4x32xf32> to vector<2x8x4x32xf32>
      %37 = arith.addf %35, %36 : vector<2x8x4x32xf32>
      %38 = math.tanh %37 : vector<2x8x4x32xf32>
      %39 = vector.shape_cast %3 : vector<1x32xf32> to vector<1x1x1x32xf32>
      %40 = vector.broadcast %39 : vector<1x1x1x32xf32> to vector<2x8x4x32xf32>
      %41 = arith.mulf %38, %40 : vector<2x8x4x32xf32>
      %cst_29 = arith.constant dense<0.000000e+00> : vector<2x8x4xf32>
      %42 = vector.multi_reduction <add>, %41, %cst_29 [3] : vector<2x8x4x32xf32> to vector<2x8x4xf32>
      %c0_30 = arith.constant 0 : index
      %43 = arith.index_cast %27 : i32 to index
      %c0_31 = arith.constant 0 : index
      %44 = vector.load %arg9[%c0_30, %43, %c0_31] : memref<2x16x4xf32, #tpu.memory_space<vmem>>, vector<2x8x4xf32>
      tpu.vector_store %arg9[%c0_30, %43, %c0_31], %42 {strides = array<i32>} : memref<2x16x4xf32, #tpu.memory_space<vmem>>, vector<2x8x4xf32>,
    }
    %c2_i32_10 = arith.constant 2 : i32
    %c0_11 = arith.constant 0 : index
    %c0_12 = arith.constant 0 : index
    %c0_13 = arith.constant 0 : index
    %9 = vector.load %arg9[%c0_11, %c0_12, %c0_13] : memref<2x16x4xf32, #tpu.memory_space<vmem>>, vector<2x16x4xf32>
    %10 = tpu.transpose %9, [0, 2, 1] : vector<2x16x4xf32> -> vector<2x4x16xf32>
    %c0_14 = arith.constant 0 : index
    %c0_15 = arith.constant 0 : index
    %c0_16 = arith.constant 0 : index
    %11 = vector.load %arg2[%c0_14, %c0_15, %c0_16] : memref<2x1x16xf32, #tpu.memory_space<vmem>>, vector<2x1x16xf32>
    %12 = vector.broadcast %11 : vector<2x1x16xf32> to vector<2x4x16xf32>
    %13 = arith.addf %10, %12 : vector<2x4x16xf32>
    %cst_17 = arith.constant dense<0xFF800000> : vector<2x4xf32>
    %14 = vector.multi_reduction <maximumf>, %13, %cst_17 [2] : vector<2x4x16xf32> to vector<2x4xf32>
    %15 = vector.shape_cast %14 : vector<2x4xf32> to vector<2x4x1xf32>
    %16 = vector.broadcast %15 : vector<2x4x1xf32> to vector<2x4x16xf32>
    %17 = arith.subf %13, %16 : vector<2x4x16xf32>
    %18 = math.exp %17 : vector<2x4x16xf32>
    %cst_18 = arith.constant dense<0.000000e+00> : vector<2x4xf32>
    %19 = vector.multi_reduction <add>, %18, %cst_18 [2] : vector<2x4x16xf32> to vector<2x4xf32>
    %20 = vector.shape_cast %19 : vector<2x4xf32> to vector<2x4x1xf32>
    %21 = vector.broadcast %20 : vector<2x4x1xf32> to vector<2x4x16xf32>
    %22 = arith.divf %18, %21 : vector<2x4x16xf32>
    %c0_19 = arith.constant 0 : index
    %c0_20 = arith.constant 0 : index
    %c0_21 = arith.constant 0 : index
    %23 = vector.load %arg1[%c0_19, %c0_20, %c0_21] : memref<2x16x40xf32, #tpu.memory_space<vmem>>, vector<2x16x40xf32>
    "tpu.trace_start"() <{level = 10 : i32, message = "bnh,bhd->bnd"}> : () -> ()
    %cst_22 = arith.constant dense<0.000000e+00> : vector<2x4x40xf32>
    %24 = tpu.matmul %22, %23, %cst_22 {dimension_numbers = #tpu.dot_dimension_numbers<[2], [1], [1], [2], [0, 0, 0, 1, 1, 2], [0], [0]>} : vector<2x4x16xf32>, vector<2x16x40xf32>, vector<2x4x40xf32> -> vector<2x4x40xf32>
    "tpu.trace_stop"() : () -> ()
    %c0_23 = arith.constant 0 : index
    %c0_24 = arith.constant 0 : index
    %c0_25 = arith.constant 0 : index
    %25 = vector.load %arg8[%c0_23, %c0_24, %c0_25] : memref<2x4x40xf32, #tpu.memory_space<vmem>>, vector<2x4x40xf32>
    tpu.vector_store %arg8[%c0_23, %c0_24, %c0_25], %24 {strides = array<i32>} : memref<2x4x40xf32, #tpu.memory_space<vmem>>, vector<2x4x40xf32>,
    return
  }
  func.func @transform_0(%arg0: i32) -> (i32, i32, i32) {
    %c0_i32 = arith.constant 0 : i32
    %c0_i32_0 = arith.constant 0 : i32
    %c0_i32_1 = arith.constant 0 : i32
    return %arg0, %c0_i32, %c0_i32_0 : i32, i32, i32
  }
  func.func @transform_1(%arg0: i32) -> (i32, i32, i32) {
    %c0_i32 = arith.constant 0 : i32
    %c0_i32_0 = arith.constant 0 : i32
    %c0_i32_1 = arith.constant 0 : i32
    return %arg0, %c0_i32, %c0_i32_0 : i32, i32, i32
  }
  func.func @transform_2(%arg0: i32) -> (i32, i32, i32) {
    %c0_i32 = arith.constant 0 : i32
    %c0_i32_0 = arith.constant 0 : i32
    %c0_i32_1 = arith.constant 0 : i32
    return %arg0, %c0_i32, %c0_i32_0 : i32, i32, i32
  }
  func.func @transform_3(%arg0: i32) -> (i32, i32) {
    %c0_i32 = arith.constant 0 : i32
    %c0_i32_0 = arith.constant 0 : i32
    %c0_i32_1 = arith.constant 0 : i32
    return %c0_i32, %c0_i32_0 : i32, i32
  }
  func.func @transform_4(%arg0: i32) -> (i32, i32) {
    %c0_i32 = arith.constant 0 : i32
    %c0_i32_0 = arith.constant 0 : i32
    %c0_i32_1 = arith.constant 0 : i32
    return %c0_i32, %c0_i32_0 : i32, i32
  }
  func.func @transform_5(%arg0: i32) -> (i32, i32) {
    %c0_i32 = arith.constant 0 : i32
    %c0_i32_0 = arith.constant 0 : i32
    %c0_i32_1 = arith.constant 0 : i32
    return %c0_i32, %c0_i32_0 : i32, i32
  }
  func.func @transform_6(%arg0: i32) -> (i32, i32) {
    %c0_i32 = arith.constant 0 : i32
    %c0_i32_0 = arith.constant 0 : i32
    %c0_i32_1 = arith.constant 0 : i32
    return %c0_i32, %c0_i32_0 : i32, i32
  }
  func.func @transform_7(%arg0: i32) -> (i32, i32, i32) {
    %c0_i32 = arith.constant 0 : i32
    %c0_i32_0 = arith.constant 0 : i32
    %c0_i32_1 = arith.constant 0 : i32
    return %arg0, %c0_i32, %c0_i32_0 : i32, i32, i32
  }
}

</mosaic_0001>

<bundles_post_ra>
// kernel: tpu_custom_call.1
= control target key start
LH: loop header
LB: loop body
LE: loop exit
PB: predicated region body
PF: predicated region fallthrough
CT: control target
= control target key end

     0   :  { %s1433_s0 = inlined_call_operand.vmem [shape: f32[4,16,40], index: 0, kind: input, shape index: {}]   ;;  %s1434_s1 = inlined_call_operand.vmem [shape: f32[4,1,16], index: 1, kind: input, shape index: {}]   ;;  %s1435_s2 = inlined_call_operand.vmem [shape: f32[4,4,40], index: 2, kind: input, shape index: {}]   ;;  %s1436_s3 = inlined_call_operand.vmem [shape: f32[40,32], index: 3, kind: input, shape index: {}]   ;;  %s1437_s4 = inlined_call_operand.vmem [shape: f32[40,32], index: 4, kind: input, shape index: {}]   ;;  %s1438_s5 = inlined_call_operand.vmem [shape: f32[1,32], index: 5, kind: input, shape index: {}]   ;;  %s1439_s6 = inlined_call_operand.vmem [shape: f32[1,32], index: 6, kind: input, shape index: {}]   ;;  %s1440_s7 = inlined_call_operand.hbm [shape: f32[4,4,40], index: 7, kind: output, shape index: {}]  }
   0x1   :  { %1442 = sst [smem:[#allocation6_spill]] %s1437_s4 }
   0x2   :  { %1443 = sst [smem:[#allocation7_spill]] %s1438_s5 }
   0x3   :  { %12 = vsyncpa [#allocation4], 0 }
   0x4   :  { %14 = vsyncpa [#allocation4 + $0x1], 0  ;;  %s1145_s24 = smov 0   ;;  %s1147_s25 = smov 0  }
   0x5   :  { %s1149_s26 = smov 0   ;;  %s1151_s27 = smov 0  }
   0x6 LB: > { %s1166_s28 = sadd.s32 4294967295, %s1097_s27   ;;  %s910_s29 = sadd.s32 4294967294, %s1097_s27   ;;  %s1097_s27 = sphi %s1151_s27, %s1452_s27   ;;  %s1093_s26 = sphi %s1149_s26, %s1451_s26   ;;  %s1089_s25 = sphi %s1147_s25, %s1450_s25   ;;  %s1085_s24 = sphi %s1145_s24, %s1449_s24  }
   0x7   : > { %s1170_s30 = sadd.s32 1, %s1097_s27   ;;  %s189_s8 = sadd.s32 1, %s1093_s26 }
   0x8   : > { %s186_s9 = ssub.s32 %s1097_s27, %s1170_s30  ;;  %p199_p0 = scmp.ne.s32.totalorder %s1093_s26, %s1089_s25 }
   0x9   : > { %p187_p1 = scmp.eq.s32.totalorder %s186_s9, 0  ;;  %p200_p2 = scmp.eq.s32.totalorder %s1166_s28, 1 }
   0xa   : > { %p205_p3 = scmp.ne.s32.totalorder %s1089_s25, %s1085_s24  ;;  %p206_p4 = scmp.eq.s32.totalorder %s910_s29, 1 }
   0xb   : > { %s1181_s10 = scalar_select %p187_p1, %s1093_s26, %s189_s8  }
   0xc   : > { %p1183_p5 = por %p200_p2, %p199_p0  ;;  %p1187_p6 = por %p206_p4, %p205_p3 }
   0xd   : > { %p913_p7 = scmp.ge.s32.totalorder %s1097_s27, 1  ;;  %p263_p8 = scmp.lt.s32.totalorder %s1097_s27, 3 }
   0xf   : > { %p264_p9 = pnand %p913_p7, %p263_p8 }
  0x10   : > { %s1441_s13 = sand.u32 (!%p264_p9), 1, %s1089_s25   ;;  %s1446_s4 = sld [smem:[#allocation6_spill]] (!%p264_p9) }
  0x11   : > { %267 = sbr.rel (%p264_p9) target bundleno = 1053 (0x41d), region = 48  ;;  %s915_s20 = sshll.u32 (!%p264_p9), %s1166_s28, 1 }
  0x12   : > { %s1212_s21 = sshll.u32 (!%p264_p9), %s1441_s13, 3  ;;  %s1447_s5 = sld [smem:[#allocation7_spill]] (!%p264_p9) }
  0x13   : > { %p306_p10 = scmp.lt.s32.totalorder (!%p264_p9), %s915_s20, 3 }
  0x16   : > { %v1197_v0 = vld [vmem:[%s1446_s4] sm:$0xff]  ;;  %v1202_v1 = vld [vmem:[%s1446_s4 + $0x8] sm:$0xff]  ;;  %v1207_v2 = vld [vmem:[%s1446_s4 + $0x10] sm:$0xff]  ;;  %s1454_s20 = smov (!%p306_p10, %s915_s20), 3  ;;  %vm344_vm0 = vcmask 326656  }
  0x17   : > { %v1217_v3 = vld [vmem:[%s1446_s4 + $0x18] sm:$0xff]  ;;  %v1222_v4 = vld [vmem:[%s1446_s4 + $0x20] sm:$0xff]  ;;  %v335_v9 = vld [vmem:[%s1436_s3 + $0x10] sm:$0xff]  ;;  %s932_s8 = sshll.u32 %s1454_s20, 4  ;;  %s1246_s15 = scalar_lea.vmem %s1434_s1, %s1454_s20 }
  0x18   : > { %v1227_v5 = vld [vmem:[%s1447_s5] sm:$0x1]  ;;  %v336_v8 = vld [vmem:[%s1436_s3 + $0x18] sm:$0xff]  ;;  %v334_v10 = vld [vmem:[%s1436_s3 + $0x8] sm:$0xff]  ;;  %s1254_s22 = scalar_lea.vmem %s1433_s0, %s932_s8  ;;  %s920_s13 = sshll.u32 %s1454_s20, 2 }
  0x19   : > { %v1232_v6 = vld [vmem:[%s1439_s6] sm:$0x1]  ;;  %s321_s4 = scalar_lea.vmem %s1435_s2, %s920_s13  ;;  %s1269_s13 = scalar_lea.vmem [#allocation3], %s1212_s21 }
  0x1a   : > { %v337_v7 = vld [vmem:[%s1436_s3 + $0x20] sm:$0xff]  ;;  %s1271_s20 = smov 0  }
  0x1b   : > { %358 = vmatpush.msra.mxu0 %v337_v7  ;;  %v333_v11 = vld [vmem:[%s1436_s3] sm:$0xff] }
  0x1c   : > { %v324_v12 = vld [vmem:[%s321_s4] sm:$0xf]  ;;  %v325_v13 = vld [vmem:[%s321_s4 + $0x4] sm:$0xf] }
  0x1d   : > { %359 = vmatpush.msra.mxu0 %v336_v8  ;;  %340 = vst [vmem:[#allocation1] ss:$2 sm:$0xff] %v324_v12 }
  0x1e   : > { %342 = vst [vmem:[#allocation1 + $0x1] ss:$2 sm:$0xff] %v325_v13 }
  0x1f   : > { %360 = vmatpush.msra.mxu0 %v335_v9 }
  0x21   : > { %361 = vmatpush.msra.mxu0 %v334_v10 }
  0x23   : > { %362 = vmatpush.msra.mxu0 %v333_v11 }
  0x25   : > { %v343_v14 = vld.sshfl [vmem:[#allocation1] sm:$0xff pattern:$0x75316420] }
  0x26   : > { %921 = vmatmul.msk.f32.vlgmr.msra.gmra.mxu0 %vm344_vm0, %v343_v14 }
  0xa3   : > { %v1263_v15 = vpop.f32.mrf.mxu0 }
  0xa4   : > { %v1266_v16 = vrot.slane %v1263_v15, 4 }
  0xa5 LB: >> { %400 = vmatpush.msra.mxu0 %v1222_v4  ;;  %934 = vmatpush.msra.mxu1 %v1222_v4  ;;  %s922_s4 = sshll.u32 %s1101_s20, 3  ;;  %v381_v19 = vperm.slane %v1227_v5, 0  ;;  %v1313_v43 = vperm.slane %v1232_v6, 0  ;;  %vm511_vm1 = vcmask 257024   ;;  %vm594_vm2 = vcmask 1041409   ;;  %s375_s20 = sadd.s32 1, %s1101_s20   ;;  %s1101_s20 = sphi %s1271_s20, %s375_s20  }
  0xa6   : >> { %s377_s5 = scalar_lea.vmem %s1254_s22, %s922_s4  ;;  %vm596_vm3 = vcmask 1042434   ;;  %vm598_vm4 = vcmask 1043459   ;;  %vm600_vm5 = vcmask 1044484   ;;  %vm602_vm6 = vcmask 1045509   ;;  %s617_s21 = scalar_lea.vmem [#allocation2], %s922_s4 }
  0xa7   : >> { %401 = vmatpush.msra.mxu0 %v1217_v3  ;;  %935 = vmatpush.msra.mxu1 %v1217_v3  ;;  %v378_v17 = vld [vmem:[%s377_s5] sm:$0xff]  ;;  %v379_v18 = vld [vmem:[%s377_s5 + $0x10] sm:$0xff]  ;;  %vm604_vm7 = vcmask 1046534   ;;  %vm606_vm8 = vcmask 1047559   ;;  %vm618_vm9 = vcmask 31744   ;;  %p372_p11 = scmp.ge.s32.totalorder %s375_s20, 2  }
  0xa8   : > { %vm699_vm10 = vcmask (%p372_p11), 125952   ;;  %vm752_vm15 = vcmask (%p372_p11), 130048   ;;  %s933_s8 = sshll.u32 (%p372_p11), %s1166_s28, 3  ;;  %s815_s17 = sshll.u32 (%p372_p11), %s1269_s13, 4  ;;  %s816_s17 = int_to_ptr.vmem [resolvable:$true] %s815_s17 }
  0xa9   : >> { %402 = vmatpush.msra.mxu0 %v1207_v2  ;;  %936 = vmatpush.msra.mxu1 %v1207_v2  ;;  %s814_s16 = scalar_lea.hbm (%p372_p11), %s1440_s7, %s933_s8  ;;  %s1448_s19 = sand.u32 (%p372_p11), 1, %s1089_s25  }
  0xaa   : > { %s817_s18 = sshll.u32 (%p372_p11), %s814_s16, 4  ;;  %s1051_s20 = scalar_lea.hbm (%p372_p11), %s1440_s7, 16  ;;  %s818_s18 = int_to_ptr.hbm [resolvable:$true] %s817_s18 }
  0xab   : >> { %403 = vmatpush.msra.mxu0 %v1202_v1  ;;  %937 = vmatpush.msra.mxu1 %v1202_v1  ;;  %s1045_s23 = sshra.s32 (%p372_p11), %s818_s18, 4  ;;  %s1046_s23 = int_to_ptr.hbm [resolvable:$true] %s1045_s23 }
  0xac   : > { %s1047_s29 = scalar_lea.hbm (%p372_p11), %s1046_s23, 8  ;;  %p1052_p1 = scmp.lt.s32.totalorder (%p372_p11), %s1046_s23, %s1440_s7 }
  0xad   : >> { %404 = vmatpush.msra.mxu0 %v1197_v0  ;;  %938 = vmatpush.msra.mxu1 %v1197_v0  ;;  %p1048_p12 = scmp.ne.s32.totalorder (%p372_p11), %s1046_s23, %s1047_s29  ;;  %p1053_p2 = scmp.lt.s32.totalorder (%p372_p11), %s1051_s20, %s1047_s29 }
  0xae   : >> { %923 = vmatmul.msk.f32.vlgmr.msra.gmra.mxu0 %vm344_vm0, %v378_v17  ;;  %924 = vmatmul.msk.f32.vlgmr.msra.gmra.mxu1 %vm344_vm0, %v379_v18 }
  0xaf   : > { %p1049_p13 = pnand (%p372_p11), %p1048_p12, %p1183_p5  ;;  %p1054_p3 = por (%p372_p11), %p1053_p2, %p1052_p1 }
  0xb1   : > { %p1050_p0 = pneg (%p372_p11), %p1049_p13 }
  0xb3   : > { %p1055_p4 = pnand (%p372_p11), %p1054_p3, %p1050_p0 }
 0x12b   : >> { %v406_v20 = vpop.f32.mrf.mxu0  ;;  %v409_v21 = vpop.f32.mrf.mxu1 }
 0x12c   : >> { %v1293_v22 = vadd.f32 %v406_v20, %v381_v19  ;;  %v1295_v23 = vadd.f32 %v409_v21, %v381_v19 }
 0x12e   : >> { %v436_v24 = vperm.slane %v1295_v23, 0  ;;  %v428_v25 = vperm.slane %v1293_v22, 0  ;;  %v415_v26 = vrot.slane %v1293_v22, 2  ;;  %v421_v27 = vrot.slane %v1295_v23, 1 }
 0x12f   : >> { %v414_v28 = vrot.slane %v1293_v22, 1  ;;  %v422_v29 = vrot.slane %v1295_v23, 2  ;;  %v423_v38 = vrot.slane %v1295_v23, 3  ;;  %v416_v41 = vrot.slane %v1293_v22, 3 }
 0x130   : >> { %v468_v30 = vadd.f32 %v436_v24, %v1266_v16  ;;  %v460_v31 = vadd.f32 %v428_v25, %v1263_v15  ;;  %v430_v32 = vperm.slane %v415_v26, 0  ;;  %v437_v33 = vperm.slane %v421_v27, 0 }
 0x131   : >> { %v429_v34 = vperm.slane %v414_v28, 0  ;;  %v438_v35 = vperm.slane %v422_v29, 0  ;;  %v417_v42 = vrot.slane %v1293_v22, 4  ;;  %v439_v44 = vperm.slane %v423_v38, 0 }
 0x132   : >> { %989 = vtanh.f32 %v468_v30  ;;  %v462_v36 = vadd.f32 %v430_v32, %v1263_v15  ;;  %v469_v37 = vadd.f32 %v437_v33, %v1266_v16  ;;  %v431_v45 = vperm.slane %v416_v41, 0 }
 0x133   : >> { %991 = vtanh.f32 %v460_v31  ;;  %v461_v39 = vadd.f32 %v429_v34, %v1263_v15  ;;  %v470_v40 = vadd.f32 %v438_v35, %v1266_v16  ;;  %v432_v47 = vperm.slane %v417_v42, 0 }
 0x134   : >> { %993 = vtanh.f32 %v462_v36  ;;  %v471_v52 = vadd.f32 %v439_v44, %v1266_v16  ;;  %v418_v53 = vrot.slane %v1293_v22, 5  ;;  %v463_v57 = vadd.f32 %v431_v45, %v1263_v15 }
 0x135   : >> { %995 = vtanh.f32 %v469_v37  ;;  %v424_v58 = vrot.slane %v1295_v23, 4  ;;  %v464_v61 = vadd.f32 %v432_v47, %v1263_v15  ;;  %v425_v62 = vrot.slane %v1295_v23, 5 }
 0x136   : >> { %997 = vtanh.f32 %v461_v39  ;;  %v433_v9 = vperm.slane %v418_v53, 0  ;;  %v426_v18 = vrot.slane %v1295_v23, 6  ;;  %v419_v21 = vrot.slane %v1293_v22, 6 }
 0x137   : >> { %999 = vtanh.f32 %v470_v40  ;;  %v440_v11 = vperm.slane %v424_v58, 0  ;;  %v441_v13 = vperm.slane %v425_v62, 0  ;;  %v420_v27 = vrot.slane %v1293_v22, 7 }
 0x138   : >> { %v990_v46 = vpop.eup %989  ;;  %1001 = vtanh.f32 %v471_v52  ;;  %v465_v17 = vadd.f32 %v433_v9, %v1263_v15  ;;  %v442_v30 = vperm.slane %v426_v18, 0  ;;  %v434_v32 = vperm.slane %v419_v21, 0 }
 0x139   : >> { %v992_v48 = vpop.eup %991  ;;  %v503_v49 = vmul.f32 %v990_v46, %v1313_v43  ;;  %1003 = vtanh.f32 %v463_v57  ;;  %v472_v20 = vadd.f32 %v440_v11, %v1266_v16  ;;  %v473_v26 = vadd.f32 %v441_v13, %v1266_v16 }
 0x13a   : >> { %v994_v50 = vpop.eup %993  ;;  %v495_v51 = vmul.f32 %v992_v48, %v1313_v43  ;;  %1005 = vtanh.f32 %v464_v61  ;;  %v435_v34 = vperm.slane %v420_v27, 0  ;;  %v474_v36 = vadd.f32 %v442_v30, %v1266_v16 }
 0x13b   : >> { %v996_v54 = vpop.eup %995  ;;  %v536_v55 = vsel %vm511_vm1, %v503_v49, 0.0  ;;  %v497_v56 = vmul.f32 %v994_v50, %v1313_v43  ;;  %1007 = vtanh.f32 %v465_v17  ;;  %v466_v37 = vadd.f32 %v434_v32, %v1263_v15 }
 0x13c   : >> { %v998_v59 = vpop.eup %997  ;;  %537 = vadd.xlane.f32.xlu1 %v536_v55  ;;  %v512_v60 = vsel %vm511_vm1, %v495_v51, 0.0  ;;  %v504_v8 = vmul.f32 %v996_v54, %v1313_v43  ;;  %1009 = vtanh.f32 %v472_v20  ;;  %v427_v38 = vrot.slane %v1295_v23, 7 }
 0x13d   : >> { %v1000_v63 = vpop.eup %999  ;;  %513 = vadd.xlane.f32.xlu0 %v512_v60  ;;  %v518_v7 = vsel %vm511_vm1, %v497_v56, 0.0  ;;  %v496_v12 = vmul.f32 %v998_v59, %v1313_v43  ;;  %1011 = vtanh.f32 %v473_v26  ;;  %v467_v41 = vadd.f32 %v435_v34, %v1263_v15 }
 0x13e   : >> { %519 = vadd.xlane.f32.xlu2 %v518_v7  ;;  %v505_v10 = vmul.f32 %v1000_v63, %v1313_v43  ;;  %v539_v14 = vsel %vm511_vm1, %v504_v8, 0.0  ;;  %v1002_v24 = vpop.eup %1001  ;;  %1013 = vtanh.f32 %v474_v36  ;;  %v443_v47 = vperm.slane %v427_v38, 0 }
 0x13f   : >> { %v515_v25 = vsel %vm511_vm1, %v496_v12, 0.0  ;;  %v1004_v28 = vpop.eup %1003  ;;  %v506_v31 = vmul.f32 %v1002_v24, %v1313_v43  ;;  %1015 = vtanh.f32 %v466_v37  ;;  %v576_v17 = vlaneseq }
 0x140   : >> { %v542_v19 = vsel %vm511_vm1, %v505_v10, 0.0  ;;  %v1006_v29 = vpop.eup %1005  ;;  %v498_v33 = vmul.f32 %v1004_v28, %v1313_v43  ;;  %1017 = vtanh.f32 %v467_v41  ;;  %v475_v50 = vadd.f32 %v443_v47, %v1266_v16 }
 0x141   : >> { %v499_v35 = vmul.f32 %v1006_v29, %v1313_v43  ;;  %v545_v22 = vsel %vm511_vm1, %v506_v31, 0.0  ;;  %v1008_v39 = vpop.eup %1007  ;;  %v577_v20 = vand.u32 127, %v576_v17  ;;  %v748_v17 = vld [vmem:[%s1254_s22] sm:$0xff] (%p372_p11) }
 0x142   : >> { %v521_v40 = vsel %vm511_vm1, %v498_v33, 0.0  ;;  %v1010_v42 = vpop.eup %1009  ;;  %v500_v46 = vmul.f32 %v1008_v39, %v1313_v43  ;;  %1019 = vtanh.f32 %v475_v50 }
 0x143   : >> { %v524_v44 = vsel %vm511_vm1, %v499_v35, 0.0  ;;  %v1012_v45 = vpop.eup %1011  ;;  %v507_v48 = vmul.f32 %v1010_v42, %v1313_v43 }
 0x144   : >> { %540 = vadd.xlane.f32.xlu1 %v539_v14  ;;  %v508_v23 = vmul.f32 %v1012_v45, %v1313_v43  ;;  %v527_v49 = vsel %vm511_vm1, %v500_v46, 0.0  ;;  %v1014_v51 = vpop.eup %1013 }
 0x145   : >> { %516 = vadd.xlane.f32.xlu0 %v515_v25  ;;  %v548_v52 = vsel %vm511_vm1, %v507_v48, 0.0  ;;  %v1016_v53 = vpop.eup %1015  ;;  %v509_v56 = vmul.f32 %v1014_v51, %v1313_v43 }
 0x146   : >> { %543 = vadd.xlane.f32.xlu2 %v542_v19  ;;  %v551_v54 = vsel %vm511_vm1, %v508_v23, 0.0  ;;  %v1018_v55 = vpop.eup %1017  ;;  %v501_v57 = vmul.f32 %v1016_v53, %v1313_v43 }
 0x147   : >> { %v502_v58 = vmul.f32 %v1018_v55, %v1313_v43  ;;  %v554_v59 = vsel %vm511_vm1, %v509_v56, 0.0 }
 0x148   : >> { %v530_v60 = vsel %vm511_vm1, %v501_v57, 0.0  ;;  %v1020_v61 = vpop.eup %1019 }
 0x149   : >> { %v533_v62 = vsel %vm511_vm1, %v502_v58, 0.0  ;;  %v510_v63 = vmul.f32 %v1020_v61, %v1313_v43 }
 0x14b   : >> { %v557_v7 = vsel %vm511_vm1, %v510_v63, 0.0 }
 0x14c   : >> { %546 = vadd.xlane.f32.xlu1 %v545_v22 }
 0x14d   : >> { %522 = vadd.xlane.f32.xlu0 %v521_v40 }
 0x14e   : >> { %525 = vadd.xlane.f32.xlu2 %v524_v44 }
 0x154   : >> { %528 = vadd.xlane.f32.xlu1 %v527_v49 }
 0x155   : >> { %549 = vadd.xlane.f32.xlu0 %v548_v52 }
 0x156   : >> { %552 = vadd.xlane.f32.xlu2 %v551_v54 }
 0x15c   : >> { %555 = vadd.xlane.f32.xlu1 %v554_v59 }
 0x15d   : >> { %531 = vadd.xlane.f32.xlu0 %v530_v60 }
 0x15e   : >> { %534 = vadd.xlane.f32.xlu2 %v533_v62  ;;  %v1021_v62 = vld [vmem:[%s1246_s15] ss:$0 sm:$0xff] (%p372_p11) }
 0x165   : >> { %558 = vadd.xlane.f32.xlu0 %v557_v7 }
 0x1af   : >> { %v538_v8 = vpop.xlane.xlu1 %537 }
 0x1b0   : >> { %v514_v9 = vpop.xlane.xlu0 %513  ;;  %v586_v30 = vperm.slane %v538_v8, %v577_v20  ;;  %v1022_v8 = vld [vmem:[%s1246_s15 + $0x1] ss:$0 sm:$0xff] (%p372_p11) }
 0x1b1   : >> { %v520_v10 = vpop.xlane.xlu2 %519  ;;  %v578_v24 = vperm.slane %v514_v9, %v577_v20 }
 0x1b2   : >> { %v580_v29 = vperm.slane %v520_v10, %v577_v20 }
 0x1b7   : >> { %v541_v11 = vpop.xlane.xlu1 %540 }
 0x1b8   : >> { %v517_v12 = vpop.xlane.xlu0 %516  ;;  %v587_v31 = vperm.slane %v541_v11, %v577_v20 }
 0x1b9   : >> { %v544_v13 = vpop.xlane.xlu2 %543  ;;  %v579_v21 = vperm.slane %v517_v12, %v577_v20 }
 0x1ba   : >> { %v588_v36 = vperm.slane %v544_v13, %v577_v20  ;;  %v608_v37 = vsel %vm594_vm2, %v587_v31, %v586_v30 }
 0x1bb   : >> { %v595_v27 = vsel %vm594_vm2, %v579_v21, %v578_v24 }
 0x1bc   : >> { %v597_v32 = vsel %vm596_vm3, %v580_v29, %v595_v27  ;;  %v609_v48 = vsel %vm596_vm3, %v588_v36, %v608_v37 }
 0x1bf   : >> { %v547_v14 = vpop.xlane.xlu1 %546 }
 0x1c0   : >> { %v523_v18 = vpop.xlane.xlu0 %522  ;;  %v589_v38 = vperm.slane %v547_v14, %v577_v20  ;;  %v749_v14 = vld [vmem:[%s1254_s22 + $0x8] sm:$0xff] (%p372_p11) }
 0x1c1   : >> { %v526_v19 = vpop.xlane.xlu2 %525  ;;  %v581_v28 = vperm.slane %v523_v18, %v577_v20  ;;  %770 = vmatpush.msra.mxu0 (%p372_p11), %v749_v14  ;;  %v751_v18 = vld [vmem:[%s1254_s22 + $0x18] sm:$0xff] (%p372_p11) }
 0x1c2   : >> { %v582_v33 = vperm.slane %v526_v19, %v577_v20  ;;  %v610_v49 = vsel %vm598_vm4, %v589_v38, %v609_v48  ;;  %v750_v19 = vld [vmem:[%s1254_s22 + $0x10] sm:$0xff] (%p372_p11)  ;;  %793 = vmatpush.msra.mxu1 (%p372_p11), %v751_v18  ;;  %s803_s22 = scalar_lea.sflag (%p372_p11), [#allocation4], %s1448_s19 }
 0x1c3   : >> { %v599_v34 = vsel %vm598_vm4, %v581_v28, %v597_v32  ;;  %771 = vmatpush.msra.mxu0 (%p372_p11), %v748_v17  ;;  %vm799_vm4 = vcmask (%p372_p11), 322560  }
 0x1c4   : >> { %v601_v39 = vsel %vm600_vm5, %v582_v33, %v599_v34  ;;  %794 = vmatpush.msra.mxu1 (%p372_p11), %v750_v19 }
 0x1c7   : >> { %v529_v26 = vpop.xlane.xlu1 %528 }
 0x1c8   : >> { %v550_v25 = vpop.xlane.xlu0 %549  ;;  %v583_v35 = vperm.slane %v529_v26, %v577_v20 }
 0x1c9   : >> { %v553_v43 = vpop.xlane.xlu2 %552  ;;  %v590_v44 = vperm.slane %v550_v25, %v577_v20 }
 0x1ca   : >> { %v603_v42 = vsel %vm602_vm6, %v583_v35, %v601_v39  ;;  %v591_v50 = vperm.slane %v553_v43, %v577_v20 }
 0x1cb   : >> { %v611_v51 = vsel %vm600_vm5, %v590_v44, %v610_v49 }
 0x1cc   : >> { %v612_v54 = vsel %vm602_vm6, %v591_v50, %v611_v51 }
 0x1cf   : >> { %v556_v46 = vpop.xlane.xlu1 %555 }
 0x1d0   : >> { %v532_v22 = vpop.xlane.xlu0 %531  ;;  %v592_v52 = vperm.slane %v556_v46, %v577_v20 }
 0x1d1   : >> { %v584_v40 = vperm.slane %v532_v22, %v577_v20  ;;  %v535_v41 = vpop.xlane.xlu2 %534 }
 0x1d2   : >> { %v585_v45 = vperm.slane %v535_v41, %v577_v20  ;;  %v613_v56 = vsel %vm604_vm7, %v592_v52, %v612_v54 }
 0x1d3   : >> { %v605_v47 = vsel %vm604_vm7, %v584_v40, %v603_v42 }
 0x1d4   : >> { %v607_v23 = vsel %vm606_vm8, %v585_v45, %v605_v47 }
 0x1d5   : >> { %619 = vst.msk [vmem:[%s617_s21] sm:$0xff] %vm618_vm9, %v607_v23 }
 0x1d8   : >> { %v559_v53 = vpop.xlane.xlu0 %558  ;;  %374 = sbr.rel (!%p372_p11) target bundleno = 165 (0xa5), region = 99 }
 0x1d9   : >> { %v593_v55 = vperm.slane %v559_v53, %v577_v20 }
 0x1db   : >> { %v614_v57 = vsel %vm606_vm8, %v593_v55, %v613_v56 }
 0x1dc   : >> { %620 = vst.msk [vmem:[%s617_s21 + $0x10] sm:$0xff] %vm618_vm9, %v614_v57 }
 0x1e3   : > { %v621_v58 = vld [vmem:[#allocation2] sm:$0xff]  ;;  %v623_v59 = vld [vmem:[#allocation2 + $0x10] sm:$0xff]  ;;  %v622_v60 = vld [vmem:[#allocation2 + $0x8] sm:$0xff] }
 0x1e4   : > { %625 = vxpose.xlu0.b32.start [1/2] (short) (narrow) %v621_v58, 8  ;;  %657 = vxpose.xlu1.b32.start [1/2] (short) (narrow) %v623_v59, 8  ;;  %v624_v61 = vld [vmem:[#allocation2 + $0x18] sm:$0xff] }
 0x1ec   : > { %626 = vxpose.xlu0.b32.end [2/2] (short) (narrow) %v622_v60, 8  ;;  %658 = vxpose.xlu1.b32.end [2/2] (short) (narrow) %v624_v61, 8 }
 0x288   : > { %v641_v63 = vpop.trf.xlu0  ;;  %v673_v9 = vpop.trf.xlu1 }
 0x289   : > { %v697_v7 = vadd.f32 %v1021_v62, %v641_v63  ;;  %v698_v11 = vadd.f32 %v1022_v8, %v673_v9 }
 0x28b   : > { %v700_v10 = vsel %vm699_vm10, %v697_v7, -inf  ;;  %v703_v0 = vsel %vm699_vm10, %v698_v11, -inf }
 0x28c   : > { %701 = vmax.xlane.f32.xlu2 %v700_v10 }
 0x294   : > { %704 = vmax.xlane.f32.xlu2 %v703_v0 }
 0x2ff   : > { %v702_v1 = vpop.xlane.xlu2 %701 }
 0x300   : > { %v706_v2 = vsub.f32 %v697_v7, %v702_v1 }
 0x302   : > { %v708_v3 = vmul.f32 1.442695, %v706_v2 }
 0x304   : > { %1023 = vpow2.f32 %v708_v3 }
 0x307   : > { %v705_v4 = vpop.xlane.xlu2 %704 }
 0x308   : > { %v707_v5 = vsub.f32 %v698_v11, %v705_v4 }
 0x30a   : > { %v1024_v6 = vpop.eup %1023  ;;  %v710_v15 = vmul.f32 1.442695, %v707_v5 }
 0x30b   : > { %v712_v16 = vsel %vm699_vm10, %v1024_v6, 0.0 }
 0x30c   : > { %1025 = vpow2.f32 %v710_v15  ;;  %713 = vadd.xlane.f32.xlu0 %v712_v16 }
 0x312   : > { %v1026_v12 = vpop.eup %1025 }
 0x313   : > { %v715_v13 = vsel %vm699_vm10, %v1026_v12, 0.0 }
 0x314   : > { %716 = vadd.xlane.f32.xlu1 %v715_v13 }
 0x37f   : > { %v714_v20 = vpop.xlane.xlu0 %713 }
 0x380   : > { %1027 = vrcp.f32 %v714_v20  ;;  %v729_v43 = vand.u32 2147483648, %v714_v20  ;;  %v727_v28 = vand.u32 2147483647, %v714_v20  ;;  %vm723_vm12 = vweird.f32 %v714_v20 }
 0x382   : > { %v730_v31 = vor.u32 1.1754944e-38, %v729_v43  ;;  %vm728_vm14 = vcmp.eq.f32.partialorder %v727_v28, 8.507059e+37 }
 0x386   : > { %v1028_v21 = vpop.eup %1027 }
 0x387   : > { %v719_v24 = vmul.f32 %v1028_v21, %v714_v20  ;;  %v717_v25 = vpop.xlane.xlu1 %716  ;;  %vm724_vm11 = vweird.f32 %v1028_v21 }
 0x388   : > { %1029 = vrcp.f32 %v717_v25  ;;  %vm725_vm13 = vmor %vm723_vm12, %vm724_vm11  ;;  %v744_v22 = vand.u32 2147483648, %v717_v25  ;;  %v742_v38 = vand.u32 2147483647, %v717_v25  ;;  %vm738_vm1 = vweird.f32 %v717_v25 }
 0x389   : > { %v720_v26 = vsub.f32 1.0, %v719_v24 }
 0x38a   : > { %v745_v40 = vor.u32 1.1754944e-38, %v744_v22  ;;  %vm743_vm3 = vcmp.eq.f32.partialorder %v742_v38, 8.507059e+37 }
 0x38b   : > { %v721_v27 = vmul.f32 %v1028_v21, %v720_v26 }
 0x38d   : > { %v722_v29 = vadd.f32 %v1028_v21, %v721_v27 }
 0x38e   : > { %v1030_v30 = vpop.eup %1029 }
 0x38f   : > { %v734_v32 = vmul.f32 %v1030_v30, %v717_v25  ;;  %v726_v33 = vsel %vm725_vm13, %v1028_v21, %v722_v29  ;;  %vm739_vm0 = vweird.f32 %v1030_v30 }
 0x390   : > { %v731_v34 = vsel %vm728_vm14, %v730_v31, %v726_v33  ;;  %vm740_vm2 = vmor %vm738_vm1, %vm739_vm0 }
 0x391   : > { %v735_v35 = vsub.f32 1.0, %v734_v32  ;;  %v732_v36 = vmul.f32 %v1024_v6, %v731_v34 }
 0x393   : > { %v736_v37 = vmul.f32 %v1030_v30, %v735_v35  ;;  %925 = vmatmul.msk.f32.vlgmr.msra.gmra.mxu0 %vm752_vm15, %v732_v36 }
 0x395   : > { %v737_v39 = vadd.f32 %v1030_v30, %v736_v37 }
 0x397   : > { %v741_v41 = vsel %vm740_vm2, %v1030_v30, %v737_v39 }
 0x398   : > { %v746_v42 = vsel %vm743_vm3, %v745_v40, %v741_v41 }
 0x399   : > { %v747_v44 = vmul.f32 %v1026_v12, %v746_v42 }
 0x39b   : > { %926 = vmatmul.msk.f32.vlgmr.msra.gmra.mxu1 %vm752_vm15, %v747_v44 }
 0x410   : > { %v773_v45 = vpop.f32.mrf.mxu0 }
 0x411   : > { %800 = vst.msk [vmem:[%s1269_s13] sm:$0xf] %vm799_vm4, %v773_v45 }
 0x418   : > { %v796_v46 = vpop.f32.mrf.mxu1 }
 0x419   : > { %801 = vst.msk [vmem:[%s1269_s13 + $0x4] sm:$0xf] %vm799_vm4, %v796_v46 }
 0x41a   : > { %1058 = shalt.err (!%p1055_p4)
}
 0x41b   : > { %s1103_s13 = smov 64   ;;  %s1104_s21 = smov 4  }
 0x41c   : > { %939 = dma.vmem_to_hbm [thread:$0]  (%p1183_p5), %s816_s17, 128, %s818_s18, %s803_s22, %s1103_s13, %s1103_s13, %s1104_s21  }
 0x41d PF: > { %p945_p7 = scmp.ge.s32.totalorder %s1097_s27, 2  ;;  %s832_s8 = sand.u32 1, %s1085_s24  }
 0x41e   : > { %s833_s14 = scalar_lea.sflag [#allocation4], %s832_s8 }
 0x41f   : > { %p942_p8 = pnand %p945_p7, %p1187_p6 }
 0x421   : > { %p943_p9 = pneg %p942_p8 }
 0x423   : > { %1080 = dma.done.wait (%p943_p9), %s833_s14, 128  }
 0x424   : > { %1082 = vsyncadd (%p943_p9), %s833_s14, 4294967168  ;;  %p17_p10 = scmp.ge.s32.totalorder %s1170_s30, 4   ;;  %s1449_s24 = smov %s1089_s25 }
 0x425   : > { %s1450_s25 = smov %s1093_s26  ;;  %s1451_s26 = smov %s1181_s10 }
 0x426   : > { %s1452_s27 = smov %s1170_s30  ;;  %19 = sbr.rel (!%p17_p10) target bundleno = 6 (0x6), region = 110 }
 0x42b   :  { %839 = vsyncpa [#allocation4], 1 }
 0x42c   :  { %841 = vsyncpa [#allocation4 + $0x1], 1 }

</bundles_post_ra>
